<compile_context>
chip_gen: v5e
topology: v5e:2x2
jax: 0.10.0
libtpu: 0.0.40
codegen_flags: <defaults>
</compile_context>

<pallas_src>
import functools

import jax
import jax.numpy as jnp
from jax.experimental import pallas as pl
from jax.experimental.pallas import tpu as pltpu

EPS = 1e-5  # nn.BatchNorm2d default eps


def _largest_divisor_leq(n: int, k: int) -> int:
    k = max(1, min(n, k))
    for d in range(k, 0, -1):
        if n % d == 0:
            return d
    return 1


def _stats_kernel(x_ref, sumx_ref, gram_ref, *, nb):
    # x_ref: (nb, Cin, P).  sumx_ref: (1, Cin, 1), gram_ref: (1, Cin, Cin) --
    # resident f32 accumulators across the "arbitrary" step axis (axis 1).
    @pl.when(pl.program_id(1) == 0)
    def _init():
        sumx_ref[...] = jnp.zeros_like(sumx_ref)
        gram_ref[...] = jnp.zeros_like(gram_ref)

    s = sumx_ref[0]   # (Cin, 1)
    g = gram_ref[0]   # (Cin, Cin)
    for b in range(nb):  # static unroll; nb is small by construction
        xb = x_ref[b].astype(jnp.float32)            # (Cin, P)
        s = s + jnp.sum(xb, axis=1, keepdims=True)   # XLU lane reduction (free slot)
        # Gram block: MXU contraction over the large lane dim (K = P).
        g = g + jnp.einsum("cp,dp->cd", xb, xb,
                           preferred_element_type=jnp.float32)
    sumx_ref[0] = s
    gram_ref[0] = g


def _project_bn_kernel(x_ref, w_ref, scale_ref, shift_ref, o_ref, *, nb):
    # x_ref: (nb, Cin, P), w_ref: (Cout, Cin), scale/shift: (Cout, 1),
    # o_ref: (nb, Cout, P).  1x1 conv == channel matmul; fused BN affine.
    w = w_ref[...]
    scale = scale_ref[...]
    shift = shift_ref[...]
    for b in range(nb):  # static unroll
        # K = Cin matmul; f32 operands, f32 accumulation.  (Tiny K uses little
        # of the MXU but this kernel is HBM-bound, so it stays hidden.)
        y = jnp.dot(w, x_ref[b], preferred_element_type=jnp.float32)  # (Cout, P)
        o_ref[b] = (y * scale + shift).astype(o_ref.dtype)


@functools.partial(jax.jit, static_argnames=("stride", "target_step_bytes"))
def shortcut_projection(x, conv_w, conv_b, gamma, beta, *, stride=1,
                        target_step_bytes=4 * 1024 * 1024):
    """x: (N, Cin, H, W) NCHW. conv_w: (Cout, Cin, 1, 1). Returns (N, Cout, Ho, Wo).

    conv_b is accepted for interface parity but is mathematically cancelled by
    the BatchNorm mean subtraction, so it is not fed to the kernels.
    """
    del conv_b  # exactly cancelled by BN mean subtraction
    N, Cin, H, W = x.shape
    Cout = conv_w.shape[0]

    # kernel_size=1, stride=s -> output pixel (ho, wo) reads input (ho*s, wo*s).
    xs = x if stride == 1 else x[:, :, ::stride, ::stride]
    Ho, Wo = xs.shape[2], xs.shape[3]
    P = Ho * Wo
    M = N * P

    # Natural-layout view: (N, Cin, P).  Contiguous -> free reshape, no transpose.
    xc = xs.reshape(N, Cin, P)
    w = conv_w.reshape(Cout, Cin).astype(jnp.float32)

    # Batch-block size so each grid step moves ~target_step_bytes of HBM traffic
    # (review: MB-scale steps to amortize the ~0.35us per-step overhead).
    per_item_bytes = (Cin + Cout) * P * x.dtype.itemsize
    nb_want = max(1, min(32, target_step_bytes // max(1, per_item_bytes)))
    nb = _largest_divisor_leq(N, nb_want)
    num_blocks = N // nb

    # Two-TensorCore split of the pass-1 reduction (helps v7x; harmless elsewhere).
    ncs = 2 if (num_blocks >= 2 and num_blocks % 2 == 0) else 1
    steps = num_blocks // ncs

    vmem_limit = 48 * 1024 * 1024  # safe on v5e/v6e/v7x; blocks use ~<10 MiB

    # ---- pass 1: per-channel sum_x and Gram matrix over all M pixels ----
    sumx_parts, gram_parts = pl.pallas_call(
        functools.partial(_stats_kernel, nb=nb),
        out_shape=(
            jax.ShapeDtypeStruct((ncs, Cin, 1), jnp.float32),
            jax.ShapeDtypeStruct((ncs, Cin, Cin), jnp.float32),
        ),
        grid=(ncs, steps),
        in_specs=[
            pl.BlockSpec((nb, Cin, P), lambda c, i: (c * steps + i, 0, 0)),
        ],
        out_specs=(
            pl.BlockSpec((1, Cin, 1), lambda c, i: (c, 0, 0)),
            pl.BlockSpec((1, Cin, Cin), lambda c, i: (c, 0, 0)),
        ),
        compiler_params=pltpu.CompilerParams(
            dimension_semantics=("parallel", "arbitrary"),
            vmem_limit_bytes=vmem_limit),
    )(xc)

    sum_x = jnp.sum(sumx_parts, axis=0)   # (Cin, 1)
    G = jnp.sum(gram_parts, axis=0)       # (Cin, Cin)

    # ---- fuse BN into per-channel (scale, shift); tiny f32 work in wrapper ----
    inv_m = jnp.float32(1.0 / M)
    mean = jnp.dot(w, sum_x) * inv_m                                  # (Cout, 1)
    sumsq_y = jnp.einsum("oc,cd,od->o", w, G, w)[:, None]             # (Cout, 1)
    var = sumsq_y * inv_m - mean * mean        # biased variance (BN training)
    var = jnp.maximum(var, 0.0)                # guard against cancellation
    inv = jax.lax.rsqrt(var + EPS)
    scale = gamma.reshape(Cout, 1).astype(jnp.float32) * inv
    shift = beta.reshape(Cout, 1).astype(jnp.float32) - mean * scale

    # ---- pass 2: projection per batch block + fused affine ----
    out3 = pl.pallas_call(
        functools.partial(_project_bn_kernel, nb=nb),
        out_shape=jax.ShapeDtypeStruct((N, Cout, P), x.dtype),
        grid=(num_blocks,),
        in_specs=[
            pl.BlockSpec((nb, Cin, P), lambda i: (i, 0, 0)),
            pl.BlockSpec((Cout, Cin), lambda i: (0, 0)),
            pl.BlockSpec((Cout, 1), lambda i: (0, 0)),
            pl.BlockSpec((Cout, 1), lambda i: (0, 0)),
        ],
        out_specs=pl.BlockSpec((nb, Cout, P), lambda i: (i, 0, 0)),
        compiler_params=pltpu.CompilerParams(
            dimension_semantics=("parallel",),
            vmem_limit_bytes=vmem_limit),
    )(xc, w, scale, shift)

    # Free reshape back to NCHW (no transpose needed in this layout).
    return out3.reshape(N, Cout, Ho, Wo)


def _reference(x, conv_w, conv_b, gamma, beta, *, stride=1):
    """Pure-JAX reference (bias included, two-pass variance) for correctness check."""
    xs = x[:, :, ::stride, ::stride]
    y = jnp.einsum("nchw,oc->nohw", xs,
                   conv_w.reshape(conv_w.shape[0], conv_w.shape[1]))
    y = y + conv_b[None, :, None, None]
    mean = jnp.mean(y, axis=(0, 2, 3), keepdims=True)
    var = jnp.mean((y - mean) ** 2, axis=(0, 2, 3), keepdims=True)
    yhat = (y - mean) * jax.lax.rsqrt(var + EPS)
    return yhat * gamma[None, :, None, None] + beta[None, :, None, None]


if __name__ == "__main__":
    # Module config: in_channels=4, out_channels=8, stride=2
    N, Cin, Cout, H, W, stride = 2, 4, 8, 16, 16, 2

    key = jax.random.PRNGKey(0)
    kx, kw, kb = jax.random.split(key, 3)

    x = jax.random.normal(kx, (N, Cin, H, W), dtype=jnp.float32)

    # Parameter init (shapes from nn.Conv2d / nn.BatchNorm2d __init__)
    fan_in = Cin * 1 * 1
    bound = 1.0 / (fan_in ** 0.5)
    conv_w = jax.random.uniform(kw, (Cout, Cin, 1, 1), jnp.float32, -bound, bound)
    conv_b = jax.random.uniform(kb, (Cout,), jnp.float32, -bound, bound)
    gamma = jnp.ones((Cout,), jnp.float32)   # BN weight default
    beta = jnp.zeros((Cout,), jnp.float32)   # BN bias default

    out = shortcut_projection(x, conv_w, conv_b, gamma, beta, stride=stride)
    out = jax.block_until_ready(out)

    ref = _reference(x, conv_w, conv_b, gamma, beta, stride=stride)
    assert out.shape == (N, Cout, H // stride, W // stride), out.shape
    assert jnp.allclose(out, ref, atol=1e-4, rtol=1e-4), "mismatch vs reference"

    print("KERNEL_OK")
</pallas_src>

<mosaic_0001>
module attributes {stable_mosaic.version = 11 : i64} {
  func.func @_stats_kernel(%arg0: i32, %arg1: i32, %arg2: memref<2x4x64xf32, #tpu.memory_space<vmem>>, %arg3: memref<1x4x1xf32, #tpu.memory_space<vmem>>, %arg4: memref<1x4x4xf32, #tpu.memory_space<vmem>>) attributes {dimension_semantics = [#tpu.dimension_semantics<parallel>, #tpu.dimension_semantics<arbitrary>], iteration_bounds = array<i64: 1, 1>, scalar_prefetch = 0 : i64, scratch_operands = 0 : i64, tpu.core_type = #tpu.core_type<tc>, window_params = [{transform_indices = @transform_0, window_bounds = array<i64: 2, 4, 64>}, {transform_indices = @transform_1, window_bounds = array<i64: 1, 4, 1>}, {transform_indices = @transform_2, window_bounds = array<i64: 1, 4, 4>}]} {
    %c0_i32 = arith.constant 0 : i32
    %0 = arith.cmpi eq, %arg1, %c0_i32 : i32
    %1 = arith.extui %0 : i1 to i32
    %c0_i32_0 = arith.constant 0 : i32
    %2 = arith.cmpi ne, %1, %c0_i32_0 : i32
    scf.if %2 {
      %cst_20 = arith.constant 0.000000e+00 : f32
      %27 = vector.broadcast %cst_20 : f32 to vector<1x4x1xf32>
      %c0_21 = arith.constant 0 : index
      %c0_22 = arith.constant 0 : index
      %c0_23 = arith.constant 0 : index
      %28 = vector.load %arg3[%c0_21, %c0_22, %c0_23] : memref<1x4x1xf32, #tpu.memory_space<vmem>>, vector<1x4x1xf32>
      tpu.vector_store %arg3[%c0_21, %c0_22, %c0_23], %27 {strides = array<i32>} : memref<1x4x1xf32, #tpu.memory_space<vmem>>, vector<1x4x1xf32>,
      %cst_24 = arith.constant 0.000000e+00 : f32
      %29 = vector.broadcast %cst_24 : f32 to vector<1x4x4xf32>
      %c0_25 = arith.constant 0 : index
      %c0_26 = arith.constant 0 : index
      %c0_27 = arith.constant 0 : index
      %30 = vector.load %arg4[%c0_25, %c0_26, %c0_27] : memref<1x4x4xf32, #tpu.memory_space<vmem>>, vector<1x4x4xf32>
      tpu.vector_store %arg4[%c0_25, %c0_26, %c0_27], %29 {strides = array<i32>} : memref<1x4x4xf32, #tpu.memory_space<vmem>>, vector<1x4x4xf32>,
    } else {
    }
    %c0 = arith.constant 0 : index
    %c0_1 = arith.constant 0 : index
    %c0_2 = arith.constant 0 : index
    %3 = vector.load %arg3[%c0, %c0_1, %c0_2] : memref<1x4x1xf32, #tpu.memory_space<vmem>>, vector<1x4x1xf32>
    %4 = vector.shape_cast %3 : vector<1x4x1xf32> to vector<4x1xf32>
    %c0_3 = arith.constant 0 : index
    %c0_4 = arith.constant 0 : index
    %c0_5 = arith.constant 0 : index
    %5 = vector.load %arg4[%c0_3, %c0_4, %c0_5] : memref<1x4x4xf32, #tpu.memory_space<vmem>>, vector<1x4x4xf32>
    %6 = vector.shape_cast %5 : vector<1x4x4xf32> to vector<4x4xf32>
    %c0_6 = arith.constant 0 : index
    %c0_7 = arith.constant 0 : index
    %c0_8 = arith.constant 0 : index
    %7 = vector.load %arg2[%c0_6, %c0_7, %c0_8] : memref<2x4x64xf32, #tpu.memory_space<vmem>>, vector<1x4x64xf32>
    %8 = vector.shape_cast %7 : vector<1x4x64xf32> to vector<4x64xf32>
    %cst = arith.constant dense<0.000000e+00> : vector<4xf32>
    %9 = vector.multi_reduction <add>, %8, %cst [1] : vector<4x64xf32> to vector<4xf32>
    %10 = vector.shape_cast %9 : vector<4xf32> to vector<4x1xf32>
    %11 = arith.addf %4, %10 : vector<4x1xf32>
    "tpu.trace_start"() <{level = 10 : i32, message = "cp,dp->cd"}> : () -> ()
    %cst_9 = arith.constant dense<0.000000e+00> : vector<4x4xf32>
    %12 = tpu.matmul %8, %8, %cst_9 {dimension_numbers = #tpu.dot_dimension_numbers<[1], [1], [0], [0], [0, 0, 1, 0], [], []>} : vector<4x64xf32>, vector<4x64xf32>, vector<4x4xf32> -> vector<4x4xf32>
    "tpu.trace_stop"() : () -> ()
    %13 = arith.addf %6, %12 : vector<4x4xf32>
    %c1 = arith.constant 1 : index
    %c0_10 = arith.constant 0 : index
    %c0_11 = arith.constant 0 : index
    %14 = vector.load %arg2[%c1, %c0_10, %c0_11] : memref<2x4x64xf32, #tpu.memory_space<vmem>>, vector<1x4x64xf32>
    %15 = vector.shape_cast %14 : vector<1x4x64xf32> to vector<4x64xf32>
    %cst_12 = arith.constant dense<0.000000e+00> : vector<4xf32>
    %16 = vector.multi_reduction <add>, %15, %cst_12 [1] : vector<4x64xf32> to vector<4xf32>
    %17 = vector.shape_cast %16 : vector<4xf32> to vector<4x1xf32>
    %18 = arith.addf %11, %17 : vector<4x1xf32>
    "tpu.trace_start"() <{level = 10 : i32, message = "cp,dp->cd"}> : () -> ()
    %cst_13 = arith.constant dense<0.000000e+00> : vector<4x4xf32>
    %19 = tpu.matmul %15, %15, %cst_13 {dimension_numbers = #tpu.dot_dimension_numbers<[1], [1], [0], [0], [0, 0, 1, 0], [], []>} : vector<4x64xf32>, vector<4x64xf32>, vector<4x4xf32> -> vector<4x4xf32>
    "tpu.trace_stop"() : () -> ()
    %20 = arith.addf %13, %19 : vector<4x4xf32>
    %c0_14 = arith.constant 0 : index
    %c0_15 = arith.constant 0 : index
    %c0_16 = arith.constant 0 : index
    %21 = vector.load %arg3[%c0_14, %c0_15, %c0_16] : memref<1x4x1xf32, #tpu.memory_space<vmem>>, vector<1x4x1xf32>
    %22 = vector.shape_cast %21 : vector<1x4x1xf32> to vector<4x1xf32>
    %23 = vector.shape_cast %18 : vector<4x1xf32> to vector<1x4x1xf32>
    tpu.vector_store %arg3[%c0_14, %c0_15, %c0_16], %23 {strides = array<i32>} : memref<1x4x1xf32, #tpu.memory_space<vmem>>, vector<1x4x1xf32>,
    %c0_17 = arith.constant 0 : index
    %c0_18 = arith.constant 0 : index
    %c0_19 = arith.constant 0 : index
    %24 = vector.load %arg4[%c0_17, %c0_18, %c0_19] : memref<1x4x4xf32, #tpu.memory_space<vmem>>, vector<1x4x4xf32>
    %25 = vector.shape_cast %24 : vector<1x4x4xf32> to vector<4x4xf32>
    %26 = vector.shape_cast %20 : vector<4x4xf32> to vector<1x4x4xf32>
    tpu.vector_store %arg4[%c0_17, %c0_18, %c0_19], %26 {strides = array<i32>} : memref<1x4x4xf32, #tpu.memory_space<vmem>>, vector<1x4x4xf32>,
    return
  }
  func.func @transform_0(%arg0: i32, %arg1: i32) -> (i32, i32, i32) {
    %c1_i32 = arith.constant 1 : i32
    %0 = arith.muli %arg0, %c1_i32 : i32
    %1 = arith.addi %0, %arg1 : i32
    %c0_i32 = arith.constant 0 : i32
    %c0_i32_0 = arith.constant 0 : i32
    %c0_i32_1 = arith.constant 0 : i32
    return %1, %c0_i32, %c0_i32_0 : i32, i32, i32
  }
  func.func @transform_1(%arg0: i32, %arg1: i32) -> (i32, i32, i32) {
    %c0_i32 = arith.constant 0 : i32
    %c0_i32_0 = arith.constant 0 : i32
    %c0_i32_1 = arith.constant 0 : i32
    return %arg0, %c0_i32, %c0_i32_0 : i32, i32, i32
  }
  func.func @transform_2(%arg0: i32, %arg1: i32) -> (i32, i32, i32) {
    %c0_i32 = arith.constant 0 : i32
    %c0_i32_0 = arith.constant 0 : i32
    %c0_i32_1 = arith.constant 0 : i32
    return %arg0, %c0_i32, %c0_i32_0 : i32, i32, i32
  }
}

module attributes {stable_mosaic.version = 11 : i64} {
  func.func @_project_bn_kernel(%arg0: i32, %arg1: memref<2x4x64xf32, #tpu.memory_space<vmem>>, %arg2: memref<8x4xf32, #tpu.memory_space<vmem>>, %arg3: memref<8x1xf32, #tpu.memory_space<vmem>>, %arg4: memref<8x1xf32, #tpu.memory_space<vmem>>, %arg5: memref<2x8x64xf32, #tpu.memory_space<vmem>>) attributes {dimension_semantics = [#tpu.dimension_semantics<parallel>], iteration_bounds = array<i64: 1>, scalar_prefetch = 0 : i64, scratch_operands = 0 : i64, tpu.core_type = #tpu.core_type<tc>, window_params = [{transform_indices = @transform_0, window_bounds = array<i64: 2, 4, 64>}, {pipeline_mode = #tpu.pipeline_mode<synchronous>, transform_indices = @transform_1, window_bounds = array<i64: 8, 4>}, {pipeline_mode = #tpu.pipeline_mode<synchronous>, transform_indices = @transform_2, window_bounds = array<i64: 8, 1>}, {pipeline_mode = #tpu.pipeline_mode<synchronous>, transform_indices = @transform_3, window_bounds = array<i64: 8, 1>}, {transform_indices = @transform_4, window_bounds = array<i64: 2, 8, 64>}]} {
    %c0 = arith.constant 0 : index
    %c0_0 = arith.constant 0 : index
    %0 = vector.load %arg2[%c0, %c0_0] : memref<8x4xf32, #tpu.memory_space<vmem>>, vector<8x4xf32>
    %c0_1 = arith.constant 0 : index
    %c0_2 = arith.constant 0 : index
    %1 = vector.load %arg3[%c0_1, %c0_2] : memref<8x1xf32, #tpu.memory_space<vmem>>, vector<8x1xf32>
    %c0_3 = arith.constant 0 : index
    %c0_4 = arith.constant 0 : index
    %2 = vector.load %arg4[%c0_3, %c0_4] : memref<8x1xf32, #tpu.memory_space<vmem>>, vector<8x1xf32>
    %c0_5 = arith.constant 0 : index
    %c0_6 = arith.constant 0 : index
    %c0_7 = arith.constant 0 : index
    %3 = vector.load %arg1[%c0_5, %c0_6, %c0_7] : memref<2x4x64xf32, #tpu.memory_space<vmem>>, vector<1x4x64xf32>
    %4 = vector.shape_cast %3 : vector<1x4x64xf32> to vector<4x64xf32>
    %cst = arith.constant dense<0.000000e+00> : vector<8x64xf32>
    %5 = tpu.matmul %0, %4, %cst {dimension_numbers = #tpu.dot_dimension_numbers<[1], [0], [0], [1], [0, 0, 1, 1], [], []>} : vector<8x4xf32>, vector<4x64xf32>, vector<8x64xf32> -> vector<8x64xf32>
    %6 = vector.broadcast %1 : vector<8x1xf32> to vector<8x64xf32>
    %7 = arith.mulf %5, %6 : vector<8x64xf32>
    %8 = vector.broadcast %2 : vector<8x1xf32> to vector<8x64xf32>
    %9 = arith.addf %7, %8 : vector<8x64xf32>
    %c0_8 = arith.constant 0 : index
    %c0_9 = arith.constant 0 : index
    %c0_10 = arith.constant 0 : index
    %10 = vector.load %arg5[%c0_8, %c0_9, %c0_10] : memref<2x8x64xf32, #tpu.memory_space<vmem>>, vector<1x8x64xf32>
    %11 = vector.shape_cast %10 : vector<1x8x64xf32> to vector<8x64xf32>
    %12 = vector.shape_cast %9 : vector<8x64xf32> to vector<1x8x64xf32>
    tpu.vector_store %arg5[%c0_8, %c0_9, %c0_10], %12 {strides = array<i32>} : memref<2x8x64xf32, #tpu.memory_space<vmem>>, vector<1x8x64xf32>,
    %c1 = arith.constant 1 : index
    %c0_11 = arith.constant 0 : index
    %c0_12 = arith.constant 0 : index
    %13 = vector.load %arg1[%c1, %c0_11, %c0_12] : memref<2x4x64xf32, #tpu.memory_space<vmem>>, vector<1x4x64xf32>
    %14 = vector.shape_cast %13 : vector<1x4x64xf32> to vector<4x64xf32>
    %cst_13 = arith.constant dense<0.000000e+00> : vector<8x64xf32>
    %15 = tpu.matmul %0, %14, %cst_13 {dimension_numbers = #tpu.dot_dimension_numbers<[1], [0], [0], [1], [0, 0, 1, 1], [], []>} : vector<8x4xf32>, vector<4x64xf32>, vector<8x64xf32> -> vector<8x64xf32>
    %16 = vector.broadcast %1 : vector<8x1xf32> to vector<8x64xf32>
    %17 = arith.mulf %15, %16 : vector<8x64xf32>
    %18 = vector.broadcast %2 : vector<8x1xf32> to vector<8x64xf32>
    %19 = arith.addf %17, %18 : vector<8x64xf32>
    %c1_14 = arith.constant 1 : index
    %c0_15 = arith.constant 0 : index
    %c0_16 = arith.constant 0 : index
    %20 = vector.load %arg5[%c1_14, %c0_15, %c0_16] : memref<2x8x64xf32, #tpu.memory_space<vmem>>, vector<1x8x64xf32>
    %21 = vector.shape_cast %20 : vector<1x8x64xf32> to vector<8x64xf32>
    %22 = vector.shape_cast %19 : vector<8x64xf32> to vector<1x8x64xf32>
    tpu.vector_store %arg5[%c1_14, %c0_15, %c0_16], %22 {strides = array<i32>} : memref<2x8x64xf32, #tpu.memory_space<vmem>>, vector<1x8x64xf32>,
    return
  }
  func.func @transform_0(%arg0: i32) -> (i32, i32, i32) {
    %c0_i32 = arith.constant 0 : i32
    %c0_i32_0 = arith.constant 0 : i32
    %c0_i32_1 = arith.constant 0 : i32
    return %arg0, %c0_i32, %c0_i32_0 : i32, i32, i32
  }
  func.func @transform_1(%arg0: i32) -> (i32, i32) {
    %c0_i32 = arith.constant 0 : i32
    %c0_i32_0 = arith.constant 0 : i32
    %c0_i32_1 = arith.constant 0 : i32
    return %c0_i32, %c0_i32_0 : i32, i32
  }
  func.func @transform_2(%arg0: i32) -> (i32, i32) {
    %c0_i32 = arith.constant 0 : i32
    %c0_i32_0 = arith.constant 0 : i32
    %c0_i32_1 = arith.constant 0 : i32
    return %c0_i32, %c0_i32_0 : i32, i32
  }
  func.func @transform_3(%arg0: i32) -> (i32, i32) {
    %c0_i32 = arith.constant 0 : i32
    %c0_i32_0 = arith.constant 0 : i32
    %c0_i32_1 = arith.constant 0 : i32
    return %c0_i32, %c0_i32_0 : i32, i32
  }
  func.func @transform_4(%arg0: i32) -> (i32, i32, i32) {
    %c0_i32 = arith.constant 0 : i32
    %c0_i32_0 = arith.constant 0 : i32
    %c0_i32_1 = arith.constant 0 : i32
    return %arg0, %c0_i32, %c0_i32_0 : i32, i32, i32
  }
}

</mosaic_0001>

<bundles_post_ra>
// kernel: shortcut_projection.2
= control target key start
LH: loop header
LB: loop body
LE: loop exit
PB: predicated region body
PF: predicated region fallthrough
CT: control target
= control target key end

     0   :  { %vm48_vm0 = vcmask 523264   ;;  %vm43_vm1 = vcmask 519168   ;;  %vm36_vm2 = vcmask 3072   ;;  %v127_v2 = vmov 0.0   ;;  %s169_s0 = inlined_call_operand.vmem [shape: f32[2,4,64], index: 0, kind: input, shape index: {}]   ;;  %s170_s1 = inlined_call_operand.vmem [shape: f32[1,4,1], index: 1, kind: output, shape index: {0}]   ;;  %s171_s2 = inlined_call_operand.vmem [shape: f32[1,4,4], index: 2, kind: output, shape index: {1}]  }
   0x1   :  { %v42_v0 = vld [vmem:[%s169_s0] sm:$0xf]  ;;  %v123_v1 = vld [vmem:[%s169_s0 + $0x4] sm:$0xf]  ;;  %37 = vst.msk [vmem:[%s170_s1] sm:$0xf] %vm36_vm2, %v127_v2 }
   0x2   :  { %121 = vmatpush.xpose.msk.msra.mxu0 %vm48_vm0, %v42_v0  ;;  %v44_v3 = vsel %vm43_vm1, %v42_v0, 0.0  ;;  %124 = vmatpush.xpose.msk.msra.mxu1 %vm48_vm0, %v123_v1  ;;  %v75_v4 = vsel %vm43_vm1, %v123_v1, 0.0  ;;  %vm38_vm3 = vcmask 27648  }
   0x3   :  { %45 = vadd.xlane.f32.xlu0 %v44_v3  ;;  %39 = vst.msk [vmem:[%s171_s2] sm:$0xf] %vm38_vm3, %v127_v2 }
   0x5   :  { %122 = vmatmul.msk.f32.vlgmr.msra.gmra.mxu0 %vm48_vm0, %v42_v0  ;;  %125 = vmatmul.msk.f32.vlgmr.msra.gmra.mxu1 %vm48_vm0, %v123_v1 }
   0x8   :  { %v40_v6 = vld [vmem:[%s170_s1] sm:$0xf] }
   0xa   :  { %v41_v10 = vld [vmem:[%s171_s2] sm:$0xf] }
   0xb   :  { %76 = vadd.xlane.f32.xlu0 %v75_v4 }
  0x76   :  { %v46_v5 = vpop.xlane.xlu0 %45 }
  0x77   :  { %v47_v7 = vadd.f32 %v46_v5, %v40_v6 }
  0x7e   :  { %v77_v8 = vpop.xlane.xlu0 %76 }
  0x7f   :  { %v78_v9 = vadd.f32 %v77_v8, %v47_v7 }
  0x81   :  { %104 = vst.msk [vmem:[%s170_s1] sm:$0xf] %vm36_vm2, %v78_v9 }
  0x82   :  { %v69_v11 = vpop.f32.mrf.mxu0  ;;  %v99_v12 = vpop.f32.mrf.mxu1 }
  0x83   :  { %v72_v13 = vadd.f32 %v69_v11, %v41_v10 }
  0x85   :  { %v102_v14 = vadd.f32 %v99_v12, %v72_v13 }
  0x87   :  { %106 = vst.msk [vmem:[%s171_s2] sm:$0xf] %vm38_vm3, %v102_v14 }

// kernel: shortcut_projection.3
= control target key start
LH: loop header
LB: loop body
LE: loop exit
PB: predicated region body
PF: predicated region fallthrough
CT: control target
= control target key end

     0   :  { %vm25_vm0 = vcmask 1043456   ;;  %vm21_vm1 = vcmask 31744   ;;  %v104_v0 = vmov 0   ;;  %vm61_vm2 = vcmask 523264   ;;  %s151_s2 = inlined_call_operand.vmem [shape: f32[8,1], index: 2, kind: input, shape index: {}]   ;;  %s152_s0 = inlined_call_operand.vmem [shape: f32[2,4,64], index: 0, kind: input, shape index: {}]   ;;  %s153_s1 = inlined_call_operand.vmem [shape: f32[8,4], index: 1, kind: input, shape index: {}]   ;;  %s154_s3 = inlined_call_operand.vmem [shape: f32[8,1], index: 3, kind: input, shape index: {}]   ;;  %s155_s4 = inlined_call_operand.vmem [shape: f32[2,8,64], index: 4, kind: output, shape index: {}]  }
   0x1   :  { %103 = vset.pattern.permute.xlu0 %v104_v0  ;;  %v18_v1 = vld [vmem:[%s151_s2] sm:$0xff] }
   0x2   :  { %v20_v2 = vld [vmem:[%s152_s0] sm:$0xf]  ;;  %v98_v3 = vld [vmem:[%s152_s0 + $0x4] sm:$0xf]  ;;  %51 = vperm.xlu0 %103, %v18_v1  }
   0x3   :  { %96 = vmatpush.msk.msra.mxu0 %vm25_vm0, %v20_v2  ;;  %v17_v4 = vld [vmem:[%s153_s1] sm:$0xff]  ;;  %99 = vmatpush.msk.msra.mxu1 %vm25_vm0, %v98_v3 }
   0x4   :  { %97 = vmatmul.msk.f32.vlgmr.msra.gmra.mxu0 %vm21_vm1, %v17_v4  ;;  %100 = vmatmul.msk.f32.vlgmr.msra.gmra.mxu1 %vm21_vm1, %v17_v4  ;;  %v19_v5 = vld [vmem:[%s154_s3] sm:$0xff] }
   0xa   :  { %57 = vperm.xlu0 %103, %v19_v5  }
  0x74   :  { %v52_v6 = vpop.permute.xlu0 %51 }
  0x7c   :  { %v58_v10 = vpop.permute.xlu0 %57 }
  0x81   :  { %v46_v7 = vpop.f32.mrf.mxu0  ;;  %v85_v9 = vpop.f32.mrf.mxu1 }
  0x82   :  { %v54_v8 = vmul.f32 %v52_v6, %v46_v7  ;;  %v88_v11 = vmul.f32 %v85_v9, %v52_v6 }
  0x84   :  { %v60_v12 = vadd.f32 %v58_v10, %v54_v8  ;;  %v89_v13 = vadd.f32 %v88_v11, %v58_v10 }
  0x86   :  { %62 = vst.msk [vmem:[%s155_s4] sm:$0xff] %vm61_vm2, %v60_v12 }
  0x87   :  { %101 = vst.msk [vmem:[%s155_s4 + $0x8] sm:$0xff] %vm61_vm2, %v89_v13 }

</bundles_post_ra>
